<compile_context>
chip_gen: v7x
topology: tpu7x:2x2x1
jax: 0.10.0
libtpu: 0.0.40
codegen_flags: <defaults>
</compile_context>

<pallas_src>
import functools

import jax
import jax.numpy as jnp
from jax.experimental import pallas as pl
from jax.experimental.pallas import tpu as pltpu

_SUB = 8          # sublanes per batch tile
_LANE_GRAN = 128  # lane granularity
_NF = 8           # fc1 hidden features


def _round_up(x, m):
    return ((x + m - 1) // m) * m


def spirals_tqnet_kernel(p_ref, x_ref, o_ref):
    """One dense batch tile: x_ref (2, 8, L) -> o_ref (8, L). VPU + EUP only.

    p_ref layout (SMEM, f32[51]):
      [0:8)   w1[0, :]   (fc1 weights applied to x feature 0)
      [8:16)  w1[1, :]   (fc1 weights applied to x feature 1)
      [16:24) b1
      [24:32) wa         (Quasi)
      [32:40) wb
      [40:48) wc
      [48]    ba, [49] bb, [50] bc
    """
    x0 = x_ref[0]                       # (8, L) batch points, feature 0
    x1 = x_ref[1]                       # (8, L) batch points, feature 1

    a = jnp.zeros_like(x0)
    b = jnp.zeros_like(x0)
    c = jnp.zeros_like(x0)
    for j in range(_NF):                # static unroll over the 8 hidden features
        h = jnp.tanh(p_ref[j] * x0 + p_ref[8 + j] * x1 + p_ref[16 + j])   # VPU FMA + EUP tanh
        a = a + p_ref[24 + j] * h
        b = b + p_ref[32 + j] * h
        c = c + p_ref[40 + j] * (h * h)

    out = (a + p_ref[48]) * (b + p_ref[49]) + (c + p_ref[50])
    o_ref[...] = out.astype(o_ref.dtype)


def pack_params(params):
    """Flatten all 51 parameter scalars into one SMEM f32 vector."""
    w1 = params["w1"].astype(jnp.float32)                 # (2, 8), (in, out) layout
    return jnp.concatenate([
        w1[0],
        w1[1],
        params["b1"].reshape(_NF),
        params["wa"].reshape(_NF),
        params["wb"].reshape(_NF),
        params["wc"].reshape(_NF),
        params["ba"].reshape(1),
        params["bb"].reshape(1),
        params["bc"].reshape(1),
    ]).astype(jnp.float32)                                 # (51,)


@functools.partial(jax.jit, static_argnames=("max_tile_points",))
def spirals_tqnet(x, params, *, max_tile_points=262144):
    """x: (N, 2) f32 -> (N, 1) f32, matching SpiralsTQNet.forward."""
    N = x.shape[0]
    scal = pack_params(params)

    # Balanced tile sizing: cdiv the batch across grid steps (no all-padding last tile),
    # keep >= 4 steps for large N (megacore sharding / pipeline depth), cap the tile so
    # the double-buffered working set stays ~6 MiB (safe on v5e/v6e/v7x default VMEM).
    n_tiles = max(1, pl.cdiv(N, max_tile_points))
    n_tiles = max(n_tiles, min(4, max(1, N // (_SUB * _LANE_GRAN))))
    pts_per_tile = pl.cdiv(N, n_tiles)
    lanes = _round_up(pl.cdiv(pts_per_tile, _SUB), _LANE_GRAN)
    npad = n_tiles * _SUB * lanes

    # Minimal relayout: (N,2) -> feature-major (2, rows, lanes), batch dense on
    # sublanes+lanes. (Ideally the caller supplies this layout directly.)
    xt = x.astype(jnp.float32).T                           # (2, N)
    if npad != N:
        xt = jnp.pad(xt, ((0, 0), (0, npad - N)))
    x3 = xt.reshape(2, n_tiles * _SUB, lanes)

    out2d = pl.pallas_call(
        spirals_tqnet_kernel,
        out_shape=jax.ShapeDtypeStruct((n_tiles * _SUB, lanes), jnp.float32),
        grid=(n_tiles,),
        in_specs=[
            pl.BlockSpec(memory_space=pltpu.MemorySpace.SMEM),      # all 51 param scalars
            pl.BlockSpec((2, _SUB, lanes), lambda i: (0, i, 0)),    # dense batch tile of x
        ],
        out_specs=pl.BlockSpec((_SUB, lanes), lambda i: (i, 0)),    # dense output tile
        compiler_params=pltpu.CompilerParams(
            dimension_semantics=("parallel",),                      # shard batch loop on v7x
        ),
    )(scal, x3)

    return out2d.reshape(-1)[:N].reshape(N, 1)


def init_params(key):
    """Deterministic PyTorch-like init: U(-1/sqrt(fan_in), 1/sqrt(fan_in)).
    Weights are stored as (in_features, out_features) = transpose of nn.Linear.weight."""
    ks = jax.random.split(key, 8)

    def lin(kw, kb, fan_in, fan_out):
        bound = 1.0 / jnp.sqrt(fan_in)
        w = jax.random.uniform(kw, (fan_in, fan_out), jnp.float32, -bound, bound)
        b = jax.random.uniform(kb, (1, fan_out), jnp.float32, -bound, bound)
        return w, b

    w1, b1 = lin(ks[0], ks[1], 2, 8)
    wa, ba = lin(ks[2], ks[3], 8, 1)
    wb, bb = lin(ks[4], ks[5], 8, 1)
    wc, bc = lin(ks[6], ks[7], 8, 1)
    return dict(w1=w1, b1=b1, wa=wa, ba=ba, wb=wb, bb=bb, wc=wc, bc=bc)


def reference_forward(x, p):
    h = jnp.tanh(x @ p["w1"] + p["b1"])
    return (h @ p["wa"] + p["ba"]) * (h @ p["wb"] + p["bb"]) + (h * h) @ p["wc"] + p["bc"]


if __name__ == "__main__":
    key = jax.random.PRNGKey(0)
    kx, kp = jax.random.split(key)

    N = 256                                   # small batch of 2-D "spiral" points
    x = jax.random.normal(kx, (N, 2), jnp.float32)
    params = init_params(kp)

    out = jax.block_until_ready(spirals_tqnet(x, params))
    ref = reference_forward(x, params)

    assert out.shape == (N, 1)
    assert jnp.allclose(out, ref, atol=1e-4, rtol=1e-4), float(jnp.max(jnp.abs(out - ref)))

    print("KERNEL_OK")
</pallas_src>

<mosaic_0001>
module attributes {stable_mosaic.version = 11 : i64} {
  func.func @spirals_tqnet_kernel(%arg0: i32, %arg1: memref<51xf32, #tpu.memory_space<smem>>, %arg2: memref<2x8x128xf32, #tpu.memory_space<vmem>>, %arg3: memref<8x128xf32, #tpu.memory_space<vmem>>) attributes {dimension_semantics = [#tpu.dimension_semantics<parallel>], iteration_bounds = array<i64: 1>, scalar_prefetch = 0 : i64, scratch_operands = 0 : i64, tpu.core_type = #tpu.core_type<tc>, window_params = [{transform_indices = @transform_0, window_bounds = array<i64: 51>}, {transform_indices = @transform_1, window_bounds = array<i64: 2, 8, 128>}, {transform_indices = @transform_2, window_bounds = array<i64: 8, 128>}]} {
    %c0 = arith.constant 0 : index
    %c0_0 = arith.constant 0 : index
    %c0_1 = arith.constant 0 : index
    %0 = vector.load %arg2[%c0, %c0_0, %c0_1] : memref<2x8x128xf32, #tpu.memory_space<vmem>>, vector<1x8x128xf32>
    %1 = vector.shape_cast %0 : vector<1x8x128xf32> to vector<8x128xf32>
    %c1 = arith.constant 1 : index
    %c0_2 = arith.constant 0 : index
    %c0_3 = arith.constant 0 : index
    %2 = vector.load %arg2[%c1, %c0_2, %c0_3] : memref<2x8x128xf32, #tpu.memory_space<vmem>>, vector<1x8x128xf32>
    %3 = vector.shape_cast %2 : vector<1x8x128xf32> to vector<8x128xf32>
    %cst = arith.constant 0.000000e+00 : f32
    %4 = vector.broadcast %cst : f32 to vector<8x128xf32>
    %cst_4 = arith.constant 0.000000e+00 : f32
    %5 = vector.broadcast %cst_4 : f32 to vector<8x128xf32>
    %cst_5 = arith.constant 0.000000e+00 : f32
    %6 = vector.broadcast %cst_5 : f32 to vector<8x128xf32>
    %c0_6 = arith.constant 0 : index
    %7 = memref.load %arg1[%c0_6] : memref<51xf32, #tpu.memory_space<smem>>
    %8 = vector.broadcast %7 : f32 to vector<8x128xf32>
    %9 = arith.mulf %8, %1 : vector<8x128xf32>
    %c8 = arith.constant 8 : index
    %10 = memref.load %arg1[%c8] : memref<51xf32, #tpu.memory_space<smem>>
    %11 = vector.broadcast %10 : f32 to vector<8x128xf32>
    %12 = arith.mulf %11, %3 : vector<8x128xf32>
    %13 = arith.addf %9, %12 : vector<8x128xf32>
    %c16 = arith.constant 16 : index
    %14 = memref.load %arg1[%c16] : memref<51xf32, #tpu.memory_space<smem>>
    %15 = vector.broadcast %14 : f32 to vector<8x128xf32>
    %16 = arith.addf %13, %15 : vector<8x128xf32>
    %17 = math.tanh %16 : vector<8x128xf32>
    %c24 = arith.constant 24 : index
    %18 = memref.load %arg1[%c24] : memref<51xf32, #tpu.memory_space<smem>>
    %19 = vector.broadcast %18 : f32 to vector<8x128xf32>
    %20 = arith.mulf %19, %17 : vector<8x128xf32>
    %21 = arith.addf %4, %20 : vector<8x128xf32>
    %c32 = arith.constant 32 : index
    %22 = memref.load %arg1[%c32] : memref<51xf32, #tpu.memory_space<smem>>
    %23 = vector.broadcast %22 : f32 to vector<8x128xf32>
    %24 = arith.mulf %23, %17 : vector<8x128xf32>
    %25 = arith.addf %5, %24 : vector<8x128xf32>
    %c40 = arith.constant 40 : index
    %26 = memref.load %arg1[%c40] : memref<51xf32, #tpu.memory_space<smem>>
    %27 = arith.mulf %17, %17 : vector<8x128xf32>
    %28 = vector.broadcast %26 : f32 to vector<8x128xf32>
    %29 = arith.mulf %28, %27 : vector<8x128xf32>
    %30 = arith.addf %6, %29 : vector<8x128xf32>
    %c1_7 = arith.constant 1 : index
    %31 = memref.load %arg1[%c1_7] : memref<51xf32, #tpu.memory_space<smem>>
    %32 = vector.broadcast %31 : f32 to vector<8x128xf32>
    %33 = arith.mulf %32, %1 : vector<8x128xf32>
    %c9 = arith.constant 9 : index
    %34 = memref.load %arg1[%c9] : memref<51xf32, #tpu.memory_space<smem>>
    %35 = vector.broadcast %34 : f32 to vector<8x128xf32>
    %36 = arith.mulf %35, %3 : vector<8x128xf32>
    %37 = arith.addf %33, %36 : vector<8x128xf32>
    %c17 = arith.constant 17 : index
    %38 = memref.load %arg1[%c17] : memref<51xf32, #tpu.memory_space<smem>>
    %39 = vector.broadcast %38 : f32 to vector<8x128xf32>
    %40 = arith.addf %37, %39 : vector<8x128xf32>
    %41 = math.tanh %40 : vector<8x128xf32>
    %c25 = arith.constant 25 : index
    %42 = memref.load %arg1[%c25] : memref<51xf32, #tpu.memory_space<smem>>
    %43 = vector.broadcast %42 : f32 to vector<8x128xf32>
    %44 = arith.mulf %43, %41 : vector<8x128xf32>
    %45 = arith.addf %21, %44 : vector<8x128xf32>
    %c33 = arith.constant 33 : index
    %46 = memref.load %arg1[%c33] : memref<51xf32, #tpu.memory_space<smem>>
    %47 = vector.broadcast %46 : f32 to vector<8x128xf32>
    %48 = arith.mulf %47, %41 : vector<8x128xf32>
    %49 = arith.addf %25, %48 : vector<8x128xf32>
    %c41 = arith.constant 41 : index
    %50 = memref.load %arg1[%c41] : memref<51xf32, #tpu.memory_space<smem>>
    %51 = arith.mulf %41, %41 : vector<8x128xf32>
    %52 = vector.broadcast %50 : f32 to vector<8x128xf32>
    %53 = arith.mulf %52, %51 : vector<8x128xf32>
    %54 = arith.addf %30, %53 : vector<8x128xf32>
    %c2 = arith.constant 2 : index
    %55 = memref.load %arg1[%c2] : memref<51xf32, #tpu.memory_space<smem>>
    %56 = vector.broadcast %55 : f32 to vector<8x128xf32>
    %57 = arith.mulf %56, %1 : vector<8x128xf32>
    %c10 = arith.constant 10 : index
    %58 = memref.load %arg1[%c10] : memref<51xf32, #tpu.memory_space<smem>>
    %59 = vector.broadcast %58 : f32 to vector<8x128xf32>
    %60 = arith.mulf %59, %3 : vector<8x128xf32>
    %61 = arith.addf %57, %60 : vector<8x128xf32>
    %c18 = arith.constant 18 : index
    %62 = memref.load %arg1[%c18] : memref<51xf32, #tpu.memory_space<smem>>
    %63 = vector.broadcast %62 : f32 to vector<8x128xf32>
    %64 = arith.addf %61, %63 : vector<8x128xf32>
    %65 = math.tanh %64 : vector<8x128xf32>
    %c26 = arith.constant 26 : index
    %66 = memref.load %arg1[%c26] : memref<51xf32, #tpu.memory_space<smem>>
    %67 = vector.broadcast %66 : f32 to vector<8x128xf32>
    %68 = arith.mulf %67, %65 : vector<8x128xf32>
    %69 = arith.addf %45, %68 : vector<8x128xf32>
    %c34 = arith.constant 34 : index
    %70 = memref.load %arg1[%c34] : memref<51xf32, #tpu.memory_space<smem>>
    %71 = vector.broadcast %70 : f32 to vector<8x128xf32>
    %72 = arith.mulf %71, %65 : vector<8x128xf32>
    %73 = arith.addf %49, %72 : vector<8x128xf32>
    %c42 = arith.constant 42 : index
    %74 = memref.load %arg1[%c42] : memref<51xf32, #tpu.memory_space<smem>>
    %75 = arith.mulf %65, %65 : vector<8x128xf32>
    %76 = vector.broadcast %74 : f32 to vector<8x128xf32>
    %77 = arith.mulf %76, %75 : vector<8x128xf32>
    %78 = arith.addf %54, %77 : vector<8x128xf32>
    %c3 = arith.constant 3 : index
    %79 = memref.load %arg1[%c3] : memref<51xf32, #tpu.memory_space<smem>>
    %80 = vector.broadcast %79 : f32 to vector<8x128xf32>
    %81 = arith.mulf %80, %1 : vector<8x128xf32>
    %c11 = arith.constant 11 : index
    %82 = memref.load %arg1[%c11] : memref<51xf32, #tpu.memory_space<smem>>
    %83 = vector.broadcast %82 : f32 to vector<8x128xf32>
    %84 = arith.mulf %83, %3 : vector<8x128xf32>
    %85 = arith.addf %81, %84 : vector<8x128xf32>
    %c19 = arith.constant 19 : index
    %86 = memref.load %arg1[%c19] : memref<51xf32, #tpu.memory_space<smem>>
    %87 = vector.broadcast %86 : f32 to vector<8x128xf32>
    %88 = arith.addf %85, %87 : vector<8x128xf32>
    %89 = math.tanh %88 : vector<8x128xf32>
    %c27 = arith.constant 27 : index
    %90 = memref.load %arg1[%c27] : memref<51xf32, #tpu.memory_space<smem>>
    %91 = vector.broadcast %90 : f32 to vector<8x128xf32>
    %92 = arith.mulf %91, %89 : vector<8x128xf32>
    %93 = arith.addf %69, %92 : vector<8x128xf32>
    %c35 = arith.constant 35 : index
    %94 = memref.load %arg1[%c35] : memref<51xf32, #tpu.memory_space<smem>>
    %95 = vector.broadcast %94 : f32 to vector<8x128xf32>
    %96 = arith.mulf %95, %89 : vector<8x128xf32>
    %97 = arith.addf %73, %96 : vector<8x128xf32>
    %c43 = arith.constant 43 : index
    %98 = memref.load %arg1[%c43] : memref<51xf32, #tpu.memory_space<smem>>
    %99 = arith.mulf %89, %89 : vector<8x128xf32>
    %100 = vector.broadcast %98 : f32 to vector<8x128xf32>
    %101 = arith.mulf %100, %99 : vector<8x128xf32>
    %102 = arith.addf %78, %101 : vector<8x128xf32>
    %c4 = arith.constant 4 : index
    %103 = memref.load %arg1[%c4] : memref<51xf32, #tpu.memory_space<smem>>
    %104 = vector.broadcast %103 : f32 to vector<8x128xf32>
    %105 = arith.mulf %104, %1 : vector<8x128xf32>
    %c12 = arith.constant 12 : index
    %106 = memref.load %arg1[%c12] : memref<51xf32, #tpu.memory_space<smem>>
    %107 = vector.broadcast %106 : f32 to vector<8x128xf32>
    %108 = arith.mulf %107, %3 : vector<8x128xf32>
    %109 = arith.addf %105, %108 : vector<8x128xf32>
    %c20 = arith.constant 20 : index
    %110 = memref.load %arg1[%c20] : memref<51xf32, #tpu.memory_space<smem>>
    %111 = vector.broadcast %110 : f32 to vector<8x128xf32>
    %112 = arith.addf %109, %111 : vector<8x128xf32>
    %113 = math.tanh %112 : vector<8x128xf32>
    %c28 = arith.constant 28 : index
    %114 = memref.load %arg1[%c28] : memref<51xf32, #tpu.memory_space<smem>>
    %115 = vector.broadcast %114 : f32 to vector<8x128xf32>
    %116 = arith.mulf %115, %113 : vector<8x128xf32>
    %117 = arith.addf %93, %116 : vector<8x128xf32>
    %c36 = arith.constant 36 : index
    %118 = memref.load %arg1[%c36] : memref<51xf32, #tpu.memory_space<smem>>
    %119 = vector.broadcast %118 : f32 to vector<8x128xf32>
    %120 = arith.mulf %119, %113 : vector<8x128xf32>
    %121 = arith.addf %97, %120 : vector<8x128xf32>
    %c44 = arith.constant 44 : index
    %122 = memref.load %arg1[%c44] : memref<51xf32, #tpu.memory_space<smem>>
    %123 = arith.mulf %113, %113 : vector<8x128xf32>
    %124 = vector.broadcast %122 : f32 to vector<8x128xf32>
    %125 = arith.mulf %124, %123 : vector<8x128xf32>
    %126 = arith.addf %102, %125 : vector<8x128xf32>
    %c5 = arith.constant 5 : index
    %127 = memref.load %arg1[%c5] : memref<51xf32, #tpu.memory_space<smem>>
    %128 = vector.broadcast %127 : f32 to vector<8x128xf32>
    %129 = arith.mulf %128, %1 : vector<8x128xf32>
    %c13 = arith.constant 13 : index
    %130 = memref.load %arg1[%c13] : memref<51xf32, #tpu.memory_space<smem>>
    %131 = vector.broadcast %130 : f32 to vector<8x128xf32>
    %132 = arith.mulf %131, %3 : vector<8x128xf32>
    %133 = arith.addf %129, %132 : vector<8x128xf32>
    %c21 = arith.constant 21 : index
    %134 = memref.load %arg1[%c21] : memref<51xf32, #tpu.memory_space<smem>>
    %135 = vector.broadcast %134 : f32 to vector<8x128xf32>
    %136 = arith.addf %133, %135 : vector<8x128xf32>
    %137 = math.tanh %136 : vector<8x128xf32>
    %c29 = arith.constant 29 : index
    %138 = memref.load %arg1[%c29] : memref<51xf32, #tpu.memory_space<smem>>
    %139 = vector.broadcast %138 : f32 to vector<8x128xf32>
    %140 = arith.mulf %139, %137 : vector<8x128xf32>
    %141 = arith.addf %117, %140 : vector<8x128xf32>
    %c37 = arith.constant 37 : index
    %142 = memref.load %arg1[%c37] : memref<51xf32, #tpu.memory_space<smem>>
    %143 = vector.broadcast %142 : f32 to vector<8x128xf32>
    %144 = arith.mulf %143, %137 : vector<8x128xf32>
    %145 = arith.addf %121, %144 : vector<8x128xf32>
    %c45 = arith.constant 45 : index
    %146 = memref.load %arg1[%c45] : memref<51xf32, #tpu.memory_space<smem>>
    %147 = arith.mulf %137, %137 : vector<8x128xf32>
    %148 = vector.broadcast %146 : f32 to vector<8x128xf32>
    %149 = arith.mulf %148, %147 : vector<8x128xf32>
    %150 = arith.addf %126, %149 : vector<8x128xf32>
    %c6 = arith.constant 6 : index
    %151 = memref.load %arg1[%c6] : memref<51xf32, #tpu.memory_space<smem>>
    %152 = vector.broadcast %151 : f32 to vector<8x128xf32>
    %153 = arith.mulf %152, %1 : vector<8x128xf32>
    %c14 = arith.constant 14 : index
    %154 = memref.load %arg1[%c14] : memref<51xf32, #tpu.memory_space<smem>>
    %155 = vector.broadcast %154 : f32 to vector<8x128xf32>
    %156 = arith.mulf %155, %3 : vector<8x128xf32>
    %157 = arith.addf %153, %156 : vector<8x128xf32>
    %c22 = arith.constant 22 : index
    %158 = memref.load %arg1[%c22] : memref<51xf32, #tpu.memory_space<smem>>
    %159 = vector.broadcast %158 : f32 to vector<8x128xf32>
    %160 = arith.addf %157, %159 : vector<8x128xf32>
    %161 = math.tanh %160 : vector<8x128xf32>
    %c30 = arith.constant 30 : index
    %162 = memref.load %arg1[%c30] : memref<51xf32, #tpu.memory_space<smem>>
    %163 = vector.broadcast %162 : f32 to vector<8x128xf32>
    %164 = arith.mulf %163, %161 : vector<8x128xf32>
    %165 = arith.addf %141, %164 : vector<8x128xf32>
    %c38 = arith.constant 38 : index
    %166 = memref.load %arg1[%c38] : memref<51xf32, #tpu.memory_space<smem>>
    %167 = vector.broadcast %166 : f32 to vector<8x128xf32>
    %168 = arith.mulf %167, %161 : vector<8x128xf32>
    %169 = arith.addf %145, %168 : vector<8x128xf32>
    %c46 = arith.constant 46 : index
    %170 = memref.load %arg1[%c46] : memref<51xf32, #tpu.memory_space<smem>>
    %171 = arith.mulf %161, %161 : vector<8x128xf32>
    %172 = vector.broadcast %170 : f32 to vector<8x128xf32>
    %173 = arith.mulf %172, %171 : vector<8x128xf32>
    %174 = arith.addf %150, %173 : vector<8x128xf32>
    %c7 = arith.constant 7 : index
    %175 = memref.load %arg1[%c7] : memref<51xf32, #tpu.memory_space<smem>>
    %176 = vector.broadcast %175 : f32 to vector<8x128xf32>
    %177 = arith.mulf %176, %1 : vector<8x128xf32>
    %c15 = arith.constant 15 : index
    %178 = memref.load %arg1[%c15] : memref<51xf32, #tpu.memory_space<smem>>
    %179 = vector.broadcast %178 : f32 to vector<8x128xf32>
    %180 = arith.mulf %179, %3 : vector<8x128xf32>
    %181 = arith.addf %177, %180 : vector<8x128xf32>
    %c23 = arith.constant 23 : index
    %182 = memref.load %arg1[%c23] : memref<51xf32, #tpu.memory_space<smem>>
    %183 = vector.broadcast %182 : f32 to vector<8x128xf32>
    %184 = arith.addf %181, %183 : vector<8x128xf32>
    %185 = math.tanh %184 : vector<8x128xf32>
    %c31 = arith.constant 31 : index
    %186 = memref.load %arg1[%c31] : memref<51xf32, #tpu.memory_space<smem>>
    %187 = vector.broadcast %186 : f32 to vector<8x128xf32>
    %188 = arith.mulf %187, %185 : vector<8x128xf32>
    %189 = arith.addf %165, %188 : vector<8x128xf32>
    %c39 = arith.constant 39 : index
    %190 = memref.load %arg1[%c39] : memref<51xf32, #tpu.memory_space<smem>>
    %191 = vector.broadcast %190 : f32 to vector<8x128xf32>
    %192 = arith.mulf %191, %185 : vector<8x128xf32>
    %193 = arith.addf %169, %192 : vector<8x128xf32>
    %c47 = arith.constant 47 : index
    %194 = memref.load %arg1[%c47] : memref<51xf32, #tpu.memory_space<smem>>
    %195 = arith.mulf %185, %185 : vector<8x128xf32>
    %196 = vector.broadcast %194 : f32 to vector<8x128xf32>
    %197 = arith.mulf %196, %195 : vector<8x128xf32>
    %198 = arith.addf %174, %197 : vector<8x128xf32>
    %c48 = arith.constant 48 : index
    %199 = memref.load %arg1[%c48] : memref<51xf32, #tpu.memory_space<smem>>
    %200 = vector.broadcast %199 : f32 to vector<8x128xf32>
    %201 = arith.addf %189, %200 : vector<8x128xf32>
    %c49 = arith.constant 49 : index
    %202 = memref.load %arg1[%c49] : memref<51xf32, #tpu.memory_space<smem>>
    %203 = vector.broadcast %202 : f32 to vector<8x128xf32>
    %204 = arith.addf %193, %203 : vector<8x128xf32>
    %205 = arith.mulf %201, %204 : vector<8x128xf32>
    %c50 = arith.constant 50 : index
    %206 = memref.load %arg1[%c50] : memref<51xf32, #tpu.memory_space<smem>>
    %207 = vector.broadcast %206 : f32 to vector<8x128xf32>
    %208 = arith.addf %198, %207 : vector<8x128xf32>
    %209 = arith.addf %205, %208 : vector<8x128xf32>
    %c0_8 = arith.constant 0 : index
    %c0_9 = arith.constant 0 : index
    %210 = vector.load %arg3[%c0_8, %c0_9] : memref<8x128xf32, #tpu.memory_space<vmem>>, vector<8x128xf32>
    tpu.vector_store %arg3[%c0_8, %c0_9], %209 {strides = array<i32>} : memref<8x128xf32, #tpu.memory_space<vmem>>, vector<8x128xf32>,
    return
  }
  func.func @transform_0(%arg0: i32) -> i32 {
    %c0_i32 = arith.constant 0 : i32
    %c0_i32_0 = arith.constant 0 : i32
    return %c0_i32 : i32
  }
  func.func @transform_1(%arg0: i32) -> (i32, i32, i32) {
    %c0_i32 = arith.constant 0 : i32
    %c0_i32_0 = arith.constant 0 : i32
    %c0_i32_1 = arith.constant 0 : i32
    return %c0_i32, %arg0, %c0_i32_0 : i32, i32, i32
  }
  func.func @transform_2(%arg0: i32) -> (i32, i32) {
    %c0_i32 = arith.constant 0 : i32
    %c0_i32_0 = arith.constant 0 : i32
    return %arg0, %c0_i32 : i32, i32
  }
}

</mosaic_0001>

<bundles_post_ra>
// kernel: spirals_tqnet.1
= control target key start
LH: loop header
LB: loop body
LE: loop exit
PB: predicated region body
PF: predicated region fallthrough
CT: control target
= control target key end

     0   :  { %7 = vsyncpa [#allocation3], 0  ;;  %s474_s0 = inlined_call_operand.vmem [shape: f32[51], index: 0, kind: input, shape index: {}]   ;;  %s475_s1 = inlined_call_operand.vmem [shape: f32[2,8,128], index: 1, kind: input, shape index: {}]   ;;  %s476_s2 = inlined_call_operand.vmem [shape: f32[8,128], index: 2, kind: output, shape index: {}]  }
   0x1   :  { %s14_s11 = sshll.u32 %s474_s0, 4  ;;  %s15_s11 = int_to_ptr.vmem [resolvable:$true] %s14_s11 }
   0x2   :  { %s304_s12 = scalar_lea.vmem %s15_s11, 16  ;;  %p309_p1 = scmp.lt.s32.totalorder %s15_s11, %s15_s11 }
   0x3   :  { %p305_p0 = scmp.ne.s32.totalorder %s15_s11, %s304_s12  ;;  %p310_p2 = scmp.lt.s32.totalorder %s304_s12, %s304_s12 }
   0x5   :  { %p311_p3 = por %p310_p2, %p309_p1 }
   0x7   :  { %p312_p4 = pnand %p311_p3, %p305_p0 }
   0x9   :  { %315 = shalt.err (!%p312_p4)
}
   0xa   :  { %s318_s13 = smov [#allocation2]  }
   0xb   :  { %17 = dma.vmem_to_smem %s15_s11, 16, %s318_s13, [#allocation3]  }
   0xc   :  { %316 = dma.done.wait [#allocation3], 16  }
   0xd   :  { %317 = vsyncadd [#allocation3], 4294967280 }
   0xe   :  { %23 = sfence }
   0xf   :  { %s27_s14 = sld [smem:[#allocation2]]  ;;  %s242_s17 = sld [smem:[#allocation2 + $0x1]]  ;;  %v340_v0 = vld [vmem:[%s475_s1] sm:$0xff]  ;;  %v345_v1 = vld [vmem:[%s475_s1 + $0x8] sm:$0xff] }
  0x10   :  { %s237_s15 = sld [smem:[#allocation2 + $0x8]]  ;;  %s243_s18 = sld [smem:[#allocation2 + $0x9]] }
  0x11   :  { %s238_s16 = sld [smem:[#allocation2 + $0x10]]  ;;  %s347_s22 = sld [smem:[#allocation2 + $0x11]] }
  0x12   :  { %s349_s23 = sld [smem:[#allocation2 + $0x18]]  ;;  %s248_s24 = sld [smem:[#allocation2 + $0x2]] }
  0x13   :  { %s249_s25 = sld [smem:[#allocation2 + $0xa]]  ;;  %s353_s26 = sld [smem:[#allocation2 + $0x20]] }
  0x14   :  { %s355_s27 = sld [smem:[#allocation2 + $0x12]]  ;;  %s357_s1 = sld [smem:[#allocation2 + $0x28]] }
  0x15   :  { %v28_v2 = vstv %s27_s14  ;;  %s359_s28 = sld [smem:[#allocation2 + $0x19]]  ;;  %v52_v8 = vstv %s242_s17  ;;  %s254_s29 = sld [smem:[#allocation2 + $0x3]] }
  0x16   :  { %v31_v3 = vstv %s237_s15  ;;  %v29_v4 = vmul.f32 %v28_v2, %v340_v0  ;;  %v55_v9 = vstv %s243_s18  ;;  %s255_s30 = sld [smem:[#allocation2 + $0xb]]  ;;  %v53_v10 = vmul.f32 %v52_v8, %v340_v0  ;;  %s363_s3 = sld [smem:[#allocation2 + $0x21]] }
  0x17   :  { %v32_v5 = vmul.f32 %v345_v1, %v31_v3  ;;  %v35_v6 = vstv %s238_s16  ;;  %v56_v11 = vmul.f32 %v345_v1, %v55_v9  ;;  %s365_s4 = sld [smem:[#allocation2 + $0x13]]  ;;  %v59_v13 = vstv %s347_s22  ;;  %s368_s5 = sld [smem:[#allocation2 + $0x29]] }
  0x18   :  { %s370_s6 = sld [smem:[#allocation2 + $0x1a]]  ;;  %v76_v15 = vstv %s248_s24  ;;  %s372_s7 = sld [smem:[#allocation2 + $0x4]]  ;;  %v39_v26 = vstv %s349_s23 }
  0x19   :  { %v33_v7 = vadd.f32 %v32_v5, %v29_v4  ;;  %v57_v14 = vadd.f32 %v56_v11, %v53_v10  ;;  %v79_v16 = vstv %s249_s25  ;;  %s374_s8 = sld [smem:[#allocation2 + $0xc]]  ;;  %v77_v17 = vmul.f32 %v76_v15, %v340_v0  ;;  %s378_s9 = sld [smem:[#allocation2 + $0x22]] }
  0x1a   :  { %v80_v18 = vmul.f32 %v345_v1, %v79_v16  ;;  %s380_s10 = sld [smem:[#allocation2 + $0x14]]  ;;  %v83_v20 = vstv %s355_s27  ;;  %s383_s11 = sld [smem:[#allocation2 + $0x2a]]  ;;  %v43_v27 = vstv %s353_s26  ;;  %v48_v30 = vstv %s357_s1 }
  0x1b   :  { %v36_v12 = vadd.f32 %v35_v6, %v33_v7  ;;  %v60_v19 = vadd.f32 %v59_v13, %v57_v14  ;;  %s385_s12 = sld [smem:[#allocation2 + $0x1b]]  ;;  %v100_v22 = vstv %s254_s29  ;;  %s387_s13 = sld [smem:[#allocation2 + $0x5]]  ;;  %v63_v34 = vstv %s359_s28 }
  0x1c   :  { %v81_v21 = vadd.f32 %v80_v18, %v77_v17  ;;  %v103_v23 = vstv %s255_s30  ;;  %s389_s14 = sld [smem:[#allocation2 + $0xd]]  ;;  %v101_v24 = vmul.f32 %v100_v22, %v340_v0  ;;  %s393_s15 = sld [smem:[#allocation2 + $0x23]]  ;;  %v67_v37 = vstv %s363_s3 }
  0x1d   :  { %288 = vtanh.f32 %v36_v12  ;;  %v104_v25 = vmul.f32 %v345_v1, %v103_v23  ;;  %s395_s16 = sld [smem:[#allocation2 + $0x15]]  ;;  %v107_v29 = vstv %s365_s4  ;;  %s403_s17 = sld [smem:[#allocation2 + $0x6]]  ;;  %v72_v38 = vstv %s368_s5 }
  0x1e   :  { %290 = vtanh.f32 %v60_v19  ;;  %v84_v28 = vadd.f32 %v83_v20, %v81_v21  ;;  %v124_v32 = vstv %s372_s7  ;;  %s405_s18 = sld [smem:[#allocation2 + $0xe]]  ;;  %s414_s0 = sld [smem:[#allocation2 + $0x2b]]  ;;  %v87_v41 = vstv %s370_s6 }
  0x1f   :  { %v105_v31 = vadd.f32 %v104_v25, %v101_v24  ;;  %v127_v33 = vstv %s374_s8  ;;  %v125_v35 = vmul.f32 %v124_v32, %v340_v0  ;;  %s410_s19 = sld [smem:[#allocation2 + $0x16]]  ;;  %s417_s20 = sld [smem:[#allocation2 + $0x1c]]  ;;  %v91_v45 = vstv %s378_s9 }
  0x20   :  { %292 = vtanh.f32 %v84_v28  ;;  %v128_v36 = vmul.f32 %v345_v1, %v127_v33  ;;  %v131_v40 = vstv %s380_s10  ;;  %s422_s21 = sld [smem:[#allocation2 + $0x7]]  ;;  %v96_v49 = vstv %s383_s11  ;;  %s429_s22 = sld [smem:[#allocation2 + $0x24]] }
  0x21   :  { %v108_v39 = vadd.f32 %v107_v29, %v105_v31  ;;  %v148_v43 = vstv %s387_s13  ;;  %v111_v50 = vstv %s385_s12  ;;  %s432_s23 = sld [smem:[#allocation2 + $0xf]]  ;;  %s442_s25 = sld [smem:[#allocation2 + $0x2c]] }
  0x22   :  { %v129_v42 = vadd.f32 %v128_v36, %v125_v35  ;;  %v151_v44 = vstv %s389_s14  ;;  %v149_v46 = vmul.f32 %v148_v43, %v340_v0  ;;  %v115_v55 = vstv %s393_s15  ;;  %s440_s24 = sld [smem:[#allocation2 + $0x17]]  ;;  %s446_s26 = sld [smem:[#allocation2 + $0x1d]] }
  0x23   :  { %294 = vtanh.f32 %v108_v39  ;;  %v152_v47 = vmul.f32 %v345_v1, %v151_v44  ;;  %v155_v52 = vstv %s395_s16  ;;  %v172_v58 = vstv %s403_s17  ;;  %s448_s27 = sld [smem:[#allocation2 + $0x25]]  ;;  %s456_s28 = sld [smem:[#allocation2 + $0x1e]] }
  0x24   :  { %v132_v51 = vadd.f32 %v131_v40, %v129_v42  ;;  %v175_v59 = vstv %s405_s18  ;;  %v173_v62 = vmul.f32 %v172_v58, %v340_v0  ;;  %v120_v7 = vstv %s414_s0  ;;  %s452_s1 = sld [smem:[#allocation2 + $0x2d]]  ;;  %s458_s29 = sld [smem:[#allocation2 + $0x26]] }
  0x25   :  { %v153_v56 = vadd.f32 %v152_v47, %v149_v46  ;;  %v176_v63 = vmul.f32 %v345_v1, %v175_v59  ;;  %v179_v2 = vstv %s410_s19  ;;  %v135_v8 = vstv %s417_s20  ;;  %s463_s30 = sld [smem:[#allocation2 + $0x2e]]  ;;  %s281_s3 = sld [smem:[#allocation2 + $0x1f]] }
  0x26   :  { %296 = vtanh.f32 %v132_v51  ;;  %v196_v14 = vstv %s422_s21  ;;  %v139_v20 = vstv %s429_s22  ;;  %s282_s4 = sld [smem:[#allocation2 + $0x27]]  ;;  %s284_s6 = sld [smem:[#allocation2 + $0x30]] }
  0x27   :  { %v289_v48 = vpop.eup %288  ;;  %v156_v61 = vadd.f32 %v155_v52, %v153_v56  ;;  %v177_v9 = vadd.f32 %v176_v63, %v173_v62  ;;  %v197_v21 = vmul.f32 %v196_v14, %v340_v0  ;;  %v199_v22 = vstv %s432_s23  ;;  %s283_s5 = sld [smem:[#allocation2 + $0x2f]]  ;;  %s285_s7 = sld [smem:[#allocation2 + $0x31]] }
  0x28   :  { %v40_v53 = vmul.f32 %v289_v48, %v39_v26  ;;  %v47_v54 = vmul.f32 %v289_v48, %v289_v48  ;;  %v44_v57 = vmul.f32 %v289_v48, %v43_v27  ;;  %v291_v60 = vpop.eup %290  ;;  %v203_v0 = vstv %s440_s24  ;;  %s286_s8 = sld [smem:[#allocation2 + $0x32]] }
  0x29   :  { %v64_v4 = vmul.f32 %v291_v60, %v63_v34  ;;  %v68_v5 = vmul.f32 %v291_v60, %v67_v37  ;;  %v71_v6 = vmul.f32 %v291_v60, %v291_v60  ;;  %298 = vtanh.f32 %v156_v61 }
  0x2a   :  { %v49_v3 = vmul.f32 %v48_v30, %v47_v54  ;;  %v293_v10 = vpop.eup %292  ;;  %v180_v18 = vadd.f32 %v179_v2, %v177_v9  ;;  %v200_v30 = vmul.f32 %v345_v1, %v199_v22  ;;  %v144_v35 = vstv %s442_s25 }
  0x2b   :  { %v65_v11 = vadd.f32 %v64_v4, %v40_v53  ;;  %v69_v12 = vadd.f32 %v68_v5, %v44_v57  ;;  %v73_v13 = vmul.f32 %v72_v38, %v71_v6  ;;  %v88_v15 = vmul.f32 %v293_v10, %v87_v41 }
  0x2c   :  { %v92_v16 = vmul.f32 %v293_v10, %v91_v45  ;;  %v95_v17 = vmul.f32 %v293_v10, %v293_v10  ;;  %300 = vtanh.f32 %v180_v18  ;;  %v201_v36 = vadd.f32 %v200_v30, %v197_v21 }
  0x2d   :  { %v74_v19 = vadd.f32 %v73_v13, %v49_v3  ;;  %v295_v23 = vpop.eup %294  ;;  %v89_v24 = vadd.f32 %v88_v15, %v65_v11  ;;  %v159_v41 = vstv %s446_s26  ;;  %v163_v42 = vstv %s448_s27 }
  0x2e   :  { %v93_v25 = vadd.f32 %v92_v16, %v69_v12  ;;  %v97_v26 = vmul.f32 %v96_v49, %v95_v17  ;;  %v112_v27 = vmul.f32 %v295_v23, %v111_v50  ;;  %v116_v28 = vmul.f32 %v295_v23, %v115_v55 }
  0x2f   :  { %v119_v29 = vmul.f32 %v295_v23, %v295_v23  ;;  %v204_v43 = vadd.f32 %v203_v0, %v201_v36  ;;  %v168_v47 = vstv %s452_s1  ;;  %v183_v52 = vstv %s456_s28 }
  0x30   :  { %v98_v31 = vadd.f32 %v97_v26, %v74_v19  ;;  %v297_v32 = vpop.eup %296  ;;  %v113_v33 = vadd.f32 %v112_v27, %v89_v24  ;;  %v117_v37 = vadd.f32 %v116_v28, %v93_v25  ;;  %v187_v53 = vstv %s458_s29 }
  0x31   :  { %v121_v34 = vmul.f32 %v120_v7, %v119_v29  ;;  %v136_v38 = vmul.f32 %v297_v32, %v135_v8  ;;  %v140_v39 = vmul.f32 %v297_v32, %v139_v20  ;;  %v143_v40 = vmul.f32 %v297_v32, %v297_v32 }
  0x32   :  { %302 = vtanh.f32 %v204_v43  ;;  %v192_v58 = vstv %s463_s30  ;;  %v207_v3 = vstv %s281_s3  ;;  %v211_v4 = vstv %s282_s4 }
  0x33   :  { %v299_v1 = vpop.eup %298  ;;  %v122_v44 = vadd.f32 %v121_v34, %v98_v31  ;;  %v145_v45 = vmul.f32 %v144_v35, %v143_v40  ;;  %v137_v48 = vadd.f32 %v136_v38, %v113_v33  ;;  %v141_v49 = vadd.f32 %v140_v39, %v117_v37 }
  0x34   :  { %v167_v46 = vmul.f32 %v299_v1, %v299_v1  ;;  %v160_v50 = vmul.f32 %v299_v1, %v159_v41  ;;  %v164_v51 = vmul.f32 %v299_v1, %v163_v42  ;;  %v216_v8 = vstv %s283_s5 }
  0x35   :  { %v146_v55 = vadd.f32 %v145_v45, %v122_v44  ;;  %v220_v13 = vstv %s284_s6  ;;  %v223_v14 = vstv %s285_s7  ;;  %v227_v18 = vstv %s286_s8 }
  0x36   :  { %v301_v54 = vpop.eup %300  ;;  %v169_v56 = vmul.f32 %v168_v47, %v167_v46  ;;  %v161_v59 = vadd.f32 %v160_v50, %v137_v48  ;;  %v165_v60 = vadd.f32 %v164_v51, %v141_v49 }
  0x37   :  { %v191_v57 = vmul.f32 %v301_v54, %v301_v54  ;;  %v184_v61 = vmul.f32 %v301_v54, %v183_v52  ;;  %v188_v62 = vmul.f32 %v301_v54, %v187_v53 }
  0x38   :  { %v170_v63 = vadd.f32 %v169_v56, %v146_v55 }
  0x39   :  { %v193_v2 = vmul.f32 %v192_v58, %v191_v57  ;;  %v185_v5 = vadd.f32 %v184_v61, %v161_v59  ;;  %v189_v6 = vadd.f32 %v188_v62, %v165_v60 }
  0x3b   :  { %v194_v9 = vadd.f32 %v193_v2, %v170_v63 }
  0x3c   :  { %v303_v7 = vpop.eup %302 }
  0x3d   :  { %v208_v10 = vmul.f32 %v303_v7, %v207_v3  ;;  %v212_v11 = vmul.f32 %v303_v7, %v211_v4  ;;  %v215_v12 = vmul.f32 %v303_v7, %v303_v7 }
  0x3f   :  { %v209_v15 = vadd.f32 %v208_v10, %v185_v5  ;;  %v213_v16 = vadd.f32 %v212_v11, %v189_v6  ;;  %v217_v17 = vmul.f32 %v216_v8, %v215_v12 }
  0x41   :  { %v218_v19 = vadd.f32 %v217_v17, %v194_v9  ;;  %v221_v20 = vadd.f32 %v220_v13, %v209_v15  ;;  %v224_v21 = vadd.f32 %v223_v14, %v213_v16 }
  0x43   :  { %v225_v22 = vmul.f32 %v224_v21, %v221_v20  ;;  %v228_v23 = vadd.f32 %v227_v18, %v218_v19 }
  0x45   :  { %v229_v24 = vadd.f32 %v228_v23, %v225_v22 }
  0x47   :  { %230 = vst [vmem:[%s476_s2] sm:$0xff] %v229_v24 }
  0x48   :  { %235 = vsyncpa [#allocation3], 1 }

</bundles_post_ra>
